<compile_context>
chip_gen: v6e
topology: v6e:2x2x1
jax: 0.10.0
libtpu: 0.0.40
codegen_flags: <defaults>
</compile_context>

<pallas_src>
import functools

import jax
import jax.numpy as jnp
from jax import lax
from jax.experimental import pallas as pl
from jax.experimental.pallas import tpu as pltpu

n_letters = 57      # len(string.ascii_letters + " .,;'")
n_hidden = 128
n_categories = 18   # number of language categories in the tutorial

NEG_BIG = -1e30     # bias value for padded logit columns (masks them in softmax)


def _round_up(x, m):
    return ((x + m - 1) // m) * m


def rnn_seq_kernel(xwb_ref, h0_ref, wh_ref, out_ref, hfin_ref, h_scratch,
                   *, hidden_size, tc):
    """One grid step == TC RNN timesteps.

    xwb_ref : (TC, B, hidden+out_pad)  precomputed  x_t @ Wx + b  slab
    wh_ref  : (hidden, hidden+out_pad) resident fused recurrent weights
    out_ref : (TC, B, out_pad)         per-step log_softmax outputs
    hfin_ref: (B, hidden)              final hidden (written at last grid step)
    h_scratch: (B, hidden) VMEM        hidden carry across grid steps
    """
    g = pl.program_id(0)

    @pl.when(g == 0)
    def _():
        h_scratch[...] = h0_ref[...]

    wh = wh_ref[...]          # hoisted once per grid step (not per inner step)

    def step(i, h):
        # z = cat(x_t, h) @ [W_i2h^T | W_i2o^T(pad)] + [b_i2h | b_i2o(pad)]
        # with the x / bias part precomputed outside the serial loop.
        z = xwb_ref[i] + jnp.dot(h, wh, preferred_element_type=jnp.float32)
        h_new = z[:, :hidden_size]                # (B, hidden)
        logits = z[:, hidden_size:]               # (B, out_pad); padded ~= -1e30

        # log_softmax over padded lanes; padded columns contribute exp() == 0.
        m = jnp.max(logits, axis=1, keepdims=True)
        shifted = logits - m
        lse = jnp.log(jnp.sum(jnp.exp(shifted), axis=1, keepdims=True))
        out_ref[i] = shifted - lse                # lane-dense (B, out_pad) store
        return h_new

    h = lax.fori_loop(0, tc, step, h_scratch[...], unroll=True)
    h_scratch[...] = h

    @pl.when(g == pl.num_programs(0) - 1)
    def _():
        hfin_ref[...] = h


def prepare_params(w_i2h, b_i2h, w_i2o, b_i2o,
                   input_size, hidden_size, output_size):
    """One-time preprocessing of PyTorch-layout Linear params into fused,
    lane-aligned matrices. Call once at parameter-load time."""
    out_pad = _round_up(output_size, 128)        # 18 -> 128

    w_i2h_t = w_i2h.T.astype(jnp.float32)        # (in+hid, hid)
    w_i2o_t = w_i2o.T.astype(jnp.float32)        # (in+hid, out)

    wih_x, wih_h = w_i2h_t[:input_size], w_i2h_t[input_size:]
    wio_x, wio_h = w_i2o_t[:input_size], w_i2o_t[input_size:]

    # Zero-pad the logit columns 18 -> 128.
    wio_x = jnp.pad(wio_x, ((0, 0), (0, out_pad - output_size)))
    wio_h = jnp.pad(wio_h, ((0, 0), (0, out_pad - output_size)))

    # Fuse columns: [hidden | padded logits] -> one 256-wide N dimension.
    wx = jnp.concatenate([wih_x, wio_x], axis=1)   # (input_size, hid+out_pad) — row-gathered, no K pad needed
    wh = jnp.concatenate([wih_h, wio_h], axis=1)   # (hidden,     hid+out_pad)

    # Fused bias; padded logit columns get -1e30 so they vanish in log_softmax.
    b_o = jnp.full((out_pad,), NEG_BIG, jnp.float32).at[:output_size].set(
        b_i2o.astype(jnp.float32))
    b = jnp.concatenate([b_i2h.astype(jnp.float32), b_o]
                        ).reshape(1, hidden_size + out_pad)
    return wx, wh, b, out_pad


@functools.partial(jax.jit, static_argnames=("output_size", "tc"))
def rnn_sequence_forward(letter_idx, h0, wx, wh, b, *, output_size, tc):
    """Runs the whole sequence in ONE pallas_call.

    letter_idx: (T, B) int32  letter indices (lineToTensor without the one-hot)
    h0:         (B, hidden) f32
    wx: (n_letters, hidden+out_pad), wh: (hidden, hidden+out_pad), b: (1, hidden+out_pad)
    Returns (log_softmax outputs (T, B, output_size), final hidden (B, hidden)).
    """
    T, B = letter_idx.shape
    hidden_size = h0.shape[1]
    n_fused = wh.shape[1]
    out_pad = n_fused - hidden_size
    if T % tc != 0:
        raise ValueError(f"T={T} must be divisible by tc={tc}")

    # Hoisted input projection: x_t is one-hot, so x_t @ Wx + b is a row gather
    # of Wx plus the fused bias. Done once for all T*B outside the serial loop.
    xwb = wx[letter_idx] + b[0]                  # (T, B, n_fused) f32

    kernel = functools.partial(rnn_seq_kernel, hidden_size=hidden_size, tc=tc)

    out_padded, h_final = pl.pallas_call(
        kernel,
        out_shape=(
            jax.ShapeDtypeStruct((T, B, out_pad), jnp.float32),
            jax.ShapeDtypeStruct((B, hidden_size), jnp.float32),
        ),
        grid=(T // tc,),
        in_specs=[
            pl.BlockSpec((tc, B, n_fused), lambda g: (g, 0, 0)),       # xwb slab
            pl.BlockSpec((B, hidden_size), lambda g: (0, 0)),          # h0 (read at g==0)
            pl.BlockSpec((hidden_size, n_fused), lambda g: (0, 0)),    # Wh resident
        ],
        out_specs=(
            pl.BlockSpec((tc, B, out_pad), lambda g: (g, 0, 0)),       # per-slab outputs
            pl.BlockSpec((B, hidden_size), lambda g: (0, 0)),          # final hidden
        ),
        scratch_shapes=[pltpu.VMEM((B, hidden_size), jnp.float32)],    # hidden carry
        # The grid axis carries the recurrence -> sequential. (For big batches
        # on v7x, add a leading "parallel" batch-tile axis with a per-tile
        # hidden-carry index_map to use both TensorCores.)
        compiler_params=pltpu.CompilerParams(
            dimension_semantics=("arbitrary",)),
    )(xwb, h0, wh)

    return out_padded[:, :, :output_size], h_final


def _torch_linear_init(key, out_features, in_features):
    """Deterministic stand-in for nn.Linear default init: U(-1/sqrt(fan_in), +)."""
    kw, kb = jax.random.split(key)
    bound = 1.0 / jnp.sqrt(jnp.float32(in_features))
    w = jax.random.uniform(kw, (out_features, in_features), jnp.float32,
                           minval=-bound, maxval=bound)
    b = jax.random.uniform(kb, (out_features,), jnp.float32,
                           minval=-bound, maxval=bound)
    return w, b


if __name__ == "__main__":
    key = jax.random.PRNGKey(0)
    k1, k2, k3 = jax.random.split(key, 3)

    input_size, hidden_size, output_size = n_letters, n_hidden, n_categories
    combined_size = input_size + hidden_size
    T, B = 16, 8    # sequence length, batch of independent sequences
    TC = 8          # timesteps per grid step (amortizes per-grid-step overhead)

    # Parameters (deterministic, synthetic), PyTorch nn.Linear layout.
    w_i2h, b_i2h = _torch_linear_init(k1, hidden_size, combined_size)
    w_i2o, b_i2o = _torch_linear_init(k2, output_size, combined_size)

    # Deterministic batch of letter-index sequences (lineToTensor, minus one-hot).
    letter_idx = jax.random.randint(k3, (T, B), 0, input_size, dtype=jnp.int32)
    h0 = jnp.zeros((B, hidden_size), jnp.float32)                      # initHidden()

    # One-time parameter preprocessing (fuse + transpose + pad).
    wx, wh, b, out_pad = prepare_params(
        w_i2h, b_i2h, w_i2o, b_i2o, input_size, hidden_size, output_size)

    out_seq, h_final = rnn_sequence_forward(
        letter_idx, h0, wx, wh, b, output_size=output_size, tc=TC)
    jax.block_until_ready((out_seq, h_final))

    # Pure-JAX reference: step-by-step RNN.forward semantics on one-hot inputs.
    x_seq = jax.nn.one_hot(letter_idx, input_size, dtype=jnp.float32)  # (T,B,57)

    def ref_step(h, x_t):
        combined = jnp.concatenate([x_t, h], axis=1)
        h_new = combined @ w_i2h.T + b_i2h
        logits = combined @ w_i2o.T + b_i2o
        return h_new, jax.nn.log_softmax(logits, axis=1)

    h_ref, out_ref_seq = lax.scan(ref_step, h0, x_seq)

    assert out_seq.shape == (T, B, output_size)
    assert h_final.shape == (B, hidden_size)
    assert jnp.allclose(out_seq, out_ref_seq, atol=1e-4, rtol=1e-4), "output mismatch"
    assert jnp.allclose(h_final, h_ref, atol=1e-4, rtol=1e-4), "hidden mismatch"

    print("KERNEL_OK")
</pallas_src>

<mosaic_0001>
module attributes {stable_mosaic.version = 11 : i64} {
  func.func @rnn_seq_kernel(%arg0: i32, %arg1: memref<8x8x256xf32, #tpu.memory_space<vmem>>, %arg2: memref<8x128xf32, #tpu.memory_space<vmem>>, %arg3: memref<128x256xf32, #tpu.memory_space<vmem>>, %arg4: memref<8x8x128xf32, #tpu.memory_space<vmem>>, %arg5: memref<8x128xf32, #tpu.memory_space<vmem>>, %arg6: memref<8x128xf32, #tpu.memory_space<vmem>>) attributes {dimension_semantics = [#tpu.dimension_semantics<arbitrary>], iteration_bounds = array<i64: 2>, scalar_prefetch = 0 : i64, scratch_operands = 1 : i64, tpu.core_type = #tpu.core_type<tc>, window_params = [{transform_indices = @transform_0, window_bounds = array<i64: 8, 8, 256>}, {pipeline_mode = #tpu.pipeline_mode<synchronous>, transform_indices = @transform_1, window_bounds = array<i64: 8, 128>}, {pipeline_mode = #tpu.pipeline_mode<synchronous>, transform_indices = @transform_2, window_bounds = array<i64: 128, 256>}, {transform_indices = @transform_3, window_bounds = array<i64: 8, 8, 128>}, {pipeline_mode = #tpu.pipeline_mode<synchronous>, transform_indices = @transform_4, window_bounds = array<i64: 8, 128>}]} {
    %c0_i32 = arith.constant 0 : i32
    %0 = arith.cmpi eq, %arg0, %c0_i32 : i32
    %1 = arith.extui %0 : i1 to i32
    %c0_i32_0 = arith.constant 0 : i32
    %2 = arith.cmpi ne, %1, %c0_i32_0 : i32
    scf.if %2 {
      %c0_64 = arith.constant 0 : index
      %c0_65 = arith.constant 0 : index
      %177 = vector.load %arg2[%c0_64, %c0_65] : memref<8x128xf32, #tpu.memory_space<vmem>>, vector<8x128xf32>
      %c0_66 = arith.constant 0 : index
      %c0_67 = arith.constant 0 : index
      %178 = vector.load %arg6[%c0_66, %c0_67] : memref<8x128xf32, #tpu.memory_space<vmem>>, vector<8x128xf32>
      tpu.vector_store %arg6[%c0_66, %c0_67], %177 {strides = array<i32>} : memref<8x128xf32, #tpu.memory_space<vmem>>, vector<8x128xf32>,
    } else {
    }
    %c0 = arith.constant 0 : index
    %c0_1 = arith.constant 0 : index
    %3 = vector.load %arg3[%c0, %c0_1] : memref<128x256xf32, #tpu.memory_space<vmem>>, vector<128x256xf32>
    %c0_2 = arith.constant 0 : index
    %c0_3 = arith.constant 0 : index
    %4 = vector.load %arg6[%c0_2, %c0_3] : memref<8x128xf32, #tpu.memory_space<vmem>>, vector<8x128xf32>
    %c0_i32_4 = arith.constant 0 : i32
    %5 = arith.index_cast %c0_i32_4 : i32 to index
    %c0_5 = arith.constant 0 : index
    %c0_6 = arith.constant 0 : index
    %6 = vector.load %arg1[%5, %c0_5, %c0_6] : memref<8x8x256xf32, #tpu.memory_space<vmem>>, vector<1x8x256xf32>
    %7 = vector.shape_cast %6 : vector<1x8x256xf32> to vector<8x256xf32>
    %cst = arith.constant dense<0.000000e+00> : vector<8x256xf32>
    %8 = tpu.matmul %4, %3, %cst {dimension_numbers = #tpu.dot_dimension_numbers<[1], [0], [0], [1], [0, 0, 1, 1], [], []>} : vector<8x128xf32>, vector<128x256xf32>, vector<8x256xf32> -> vector<8x256xf32>
    %9 = arith.addf %7, %8 : vector<8x256xf32>
    %10 = vector.extract_strided_slice %9 {offsets = [0, 0], sizes = [8, 128], strides = [1, 1]} : vector<8x256xf32> to vector<8x128xf32>
    %11 = vector.extract_strided_slice %9 {offsets = [0, 128], sizes = [8, 128], strides = [1, 1]} : vector<8x256xf32> to vector<8x128xf32>
    %cst_7 = arith.constant dense<0xFF800000> : vector<8xf32>
    %12 = vector.multi_reduction <maximumf>, %11, %cst_7 [1] : vector<8x128xf32> to vector<8xf32>
    %13 = vector.shape_cast %12 : vector<8xf32> to vector<8x1xf32>
    %14 = vector.broadcast %13 : vector<8x1xf32> to vector<8x128xf32>
    %15 = arith.subf %11, %14 : vector<8x128xf32>
    %16 = math.exp %15 : vector<8x128xf32>
    %cst_8 = arith.constant dense<0.000000e+00> : vector<8xf32>
    %17 = vector.multi_reduction <add>, %16, %cst_8 [1] : vector<8x128xf32> to vector<8xf32>
    %18 = vector.shape_cast %17 : vector<8xf32> to vector<8x1xf32>
    %19 = math.log %18 : vector<8x1xf32>
    %20 = vector.broadcast %19 : vector<8x1xf32> to vector<8x128xf32>
    %21 = arith.subf %15, %20 : vector<8x128xf32>
    %22 = arith.index_cast %c0_i32_4 : i32 to index
    %c0_9 = arith.constant 0 : index
    %c0_10 = arith.constant 0 : index
    %23 = vector.load %arg4[%22, %c0_9, %c0_10] : memref<8x8x128xf32, #tpu.memory_space<vmem>>, vector<1x8x128xf32>
    %24 = vector.shape_cast %23 : vector<1x8x128xf32> to vector<8x128xf32>
    %25 = vector.shape_cast %21 : vector<8x128xf32> to vector<1x8x128xf32>
    tpu.vector_store %arg4[%22, %c0_9, %c0_10], %25 {strides = array<i32>} : memref<8x8x128xf32, #tpu.memory_space<vmem>>, vector<1x8x128xf32>,
    %c1_i32 = arith.constant 1 : i32
    %26 = arith.index_cast %c1_i32 : i32 to index
    %c0_11 = arith.constant 0 : index
    %c0_12 = arith.constant 0 : index
    %27 = vector.load %arg1[%26, %c0_11, %c0_12] : memref<8x8x256xf32, #tpu.memory_space<vmem>>, vector<1x8x256xf32>
    %28 = vector.shape_cast %27 : vector<1x8x256xf32> to vector<8x256xf32>
    %cst_13 = arith.constant dense<0.000000e+00> : vector<8x256xf32>
    %29 = tpu.matmul %10, %3, %cst_13 {dimension_numbers = #tpu.dot_dimension_numbers<[1], [0], [0], [1], [0, 0, 1, 1], [], []>} : vector<8x128xf32>, vector<128x256xf32>, vector<8x256xf32> -> vector<8x256xf32>
    %30 = arith.addf %28, %29 : vector<8x256xf32>
    %31 = vector.extract_strided_slice %30 {offsets = [0, 0], sizes = [8, 128], strides = [1, 1]} : vector<8x256xf32> to vector<8x128xf32>
    %32 = vector.extract_strided_slice %30 {offsets = [0, 128], sizes = [8, 128], strides = [1, 1]} : vector<8x256xf32> to vector<8x128xf32>
    %cst_14 = arith.constant dense<0xFF800000> : vector<8xf32>
    %33 = vector.multi_reduction <maximumf>, %32, %cst_14 [1] : vector<8x128xf32> to vector<8xf32>
    %34 = vector.shape_cast %33 : vector<8xf32> to vector<8x1xf32>
    %35 = vector.broadcast %34 : vector<8x1xf32> to vector<8x128xf32>
    %36 = arith.subf %32, %35 : vector<8x128xf32>
    %37 = math.exp %36 : vector<8x128xf32>
    %cst_15 = arith.constant dense<0.000000e+00> : vector<8xf32>
    %38 = vector.multi_reduction <add>, %37, %cst_15 [1] : vector<8x128xf32> to vector<8xf32>
    %39 = vector.shape_cast %38 : vector<8xf32> to vector<8x1xf32>
    %40 = math.log %39 : vector<8x1xf32>
    %41 = vector.broadcast %40 : vector<8x1xf32> to vector<8x128xf32>
    %42 = arith.subf %36, %41 : vector<8x128xf32>
    %43 = arith.index_cast %c1_i32 : i32 to index
    %c0_16 = arith.constant 0 : index
    %c0_17 = arith.constant 0 : index
    %44 = vector.load %arg4[%43, %c0_16, %c0_17] : memref<8x8x128xf32, #tpu.memory_space<vmem>>, vector<1x8x128xf32>
    %45 = vector.shape_cast %44 : vector<1x8x128xf32> to vector<8x128xf32>
    %46 = vector.shape_cast %42 : vector<8x128xf32> to vector<1x8x128xf32>
    tpu.vector_store %arg4[%43, %c0_16, %c0_17], %46 {strides = array<i32>} : memref<8x8x128xf32, #tpu.memory_space<vmem>>, vector<1x8x128xf32>,
    %c2_i32 = arith.constant 2 : i32
    %47 = arith.index_cast %c2_i32 : i32 to index
    %c0_18 = arith.constant 0 : index
    %c0_19 = arith.constant 0 : index
    %48 = vector.load %arg1[%47, %c0_18, %c0_19] : memref<8x8x256xf32, #tpu.memory_space<vmem>>, vector<1x8x256xf32>
    %49 = vector.shape_cast %48 : vector<1x8x256xf32> to vector<8x256xf32>
    %cst_20 = arith.constant dense<0.000000e+00> : vector<8x256xf32>
    %50 = tpu.matmul %31, %3, %cst_20 {dimension_numbers = #tpu.dot_dimension_numbers<[1], [0], [0], [1], [0, 0, 1, 1], [], []>} : vector<8x128xf32>, vector<128x256xf32>, vector<8x256xf32> -> vector<8x256xf32>
    %51 = arith.addf %49, %50 : vector<8x256xf32>
    %52 = vector.extract_strided_slice %51 {offsets = [0, 0], sizes = [8, 128], strides = [1, 1]} : vector<8x256xf32> to vector<8x128xf32>
    %53 = vector.extract_strided_slice %51 {offsets = [0, 128], sizes = [8, 128], strides = [1, 1]} : vector<8x256xf32> to vector<8x128xf32>
    %cst_21 = arith.constant dense<0xFF800000> : vector<8xf32>
    %54 = vector.multi_reduction <maximumf>, %53, %cst_21 [1] : vector<8x128xf32> to vector<8xf32>
    %55 = vector.shape_cast %54 : vector<8xf32> to vector<8x1xf32>
    %56 = vector.broadcast %55 : vector<8x1xf32> to vector<8x128xf32>
    %57 = arith.subf %53, %56 : vector<8x128xf32>
    %58 = math.exp %57 : vector<8x128xf32>
    %cst_22 = arith.constant dense<0.000000e+00> : vector<8xf32>
    %59 = vector.multi_reduction <add>, %58, %cst_22 [1] : vector<8x128xf32> to vector<8xf32>
    %60 = vector.shape_cast %59 : vector<8xf32> to vector<8x1xf32>
    %61 = math.log %60 : vector<8x1xf32>
    %62 = vector.broadcast %61 : vector<8x1xf32> to vector<8x128xf32>
    %63 = arith.subf %57, %62 : vector<8x128xf32>
    %64 = arith.index_cast %c2_i32 : i32 to index
    %c0_23 = arith.constant 0 : index
    %c0_24 = arith.constant 0 : index
    %65 = vector.load %arg4[%64, %c0_23, %c0_24] : memref<8x8x128xf32, #tpu.memory_space<vmem>>, vector<1x8x128xf32>
    %66 = vector.shape_cast %65 : vector<1x8x128xf32> to vector<8x128xf32>
    %67 = vector.shape_cast %63 : vector<8x128xf32> to vector<1x8x128xf32>
    tpu.vector_store %arg4[%64, %c0_23, %c0_24], %67 {strides = array<i32>} : memref<8x8x128xf32, #tpu.memory_space<vmem>>, vector<1x8x128xf32>,
    %c3_i32 = arith.constant 3 : i32
    %68 = arith.index_cast %c3_i32 : i32 to index
    %c0_25 = arith.constant 0 : index
    %c0_26 = arith.constant 0 : index
    %69 = vector.load %arg1[%68, %c0_25, %c0_26] : memref<8x8x256xf32, #tpu.memory_space<vmem>>, vector<1x8x256xf32>
    %70 = vector.shape_cast %69 : vector<1x8x256xf32> to vector<8x256xf32>
    %cst_27 = arith.constant dense<0.000000e+00> : vector<8x256xf32>
    %71 = tpu.matmul %52, %3, %cst_27 {dimension_numbers = #tpu.dot_dimension_numbers<[1], [0], [0], [1], [0, 0, 1, 1], [], []>} : vector<8x128xf32>, vector<128x256xf32>, vector<8x256xf32> -> vector<8x256xf32>
    %72 = arith.addf %70, %71 : vector<8x256xf32>
    %73 = vector.extract_strided_slice %72 {offsets = [0, 0], sizes = [8, 128], strides = [1, 1]} : vector<8x256xf32> to vector<8x128xf32>
    %74 = vector.extract_strided_slice %72 {offsets = [0, 128], sizes = [8, 128], strides = [1, 1]} : vector<8x256xf32> to vector<8x128xf32>
    %cst_28 = arith.constant dense<0xFF800000> : vector<8xf32>
    %75 = vector.multi_reduction <maximumf>, %74, %cst_28 [1] : vector<8x128xf32> to vector<8xf32>
    %76 = vector.shape_cast %75 : vector<8xf32> to vector<8x1xf32>
    %77 = vector.broadcast %76 : vector<8x1xf32> to vector<8x128xf32>
    %78 = arith.subf %74, %77 : vector<8x128xf32>
    %79 = math.exp %78 : vector<8x128xf32>
    %cst_29 = arith.constant dense<0.000000e+00> : vector<8xf32>
    %80 = vector.multi_reduction <add>, %79, %cst_29 [1] : vector<8x128xf32> to vector<8xf32>
    %81 = vector.shape_cast %80 : vector<8xf32> to vector<8x1xf32>
    %82 = math.log %81 : vector<8x1xf32>
    %83 = vector.broadcast %82 : vector<8x1xf32> to vector<8x128xf32>
    %84 = arith.subf %78, %83 : vector<8x128xf32>
    %85 = arith.index_cast %c3_i32 : i32 to index
    %c0_30 = arith.constant 0 : index
    %c0_31 = arith.constant 0 : index
    %86 = vector.load %arg4[%85, %c0_30, %c0_31] : memref<8x8x128xf32, #tpu.memory_space<vmem>>, vector<1x8x128xf32>
    %87 = vector.shape_cast %86 : vector<1x8x128xf32> to vector<8x128xf32>
    %88 = vector.shape_cast %84 : vector<8x128xf32> to vector<1x8x128xf32>
    tpu.vector_store %arg4[%85, %c0_30, %c0_31], %88 {strides = array<i32>} : memref<8x8x128xf32, #tpu.memory_space<vmem>>, vector<1x8x128xf32>,
    %c4_i32 = arith.constant 4 : i32
    %89 = arith.index_cast %c4_i32 : i32 to index
    %c0_32 = arith.constant 0 : index
    %c0_33 = arith.constant 0 : index
    %90 = vector.load %arg1[%89, %c0_32, %c0_33] : memref<8x8x256xf32, #tpu.memory_space<vmem>>, vector<1x8x256xf32>
    %91 = vector.shape_cast %90 : vector<1x8x256xf32> to vector<8x256xf32>
    %cst_34 = arith.constant dense<0.000000e+00> : vector<8x256xf32>
    %92 = tpu.matmul %73, %3, %cst_34 {dimension_numbers = #tpu.dot_dimension_numbers<[1], [0], [0], [1], [0, 0, 1, 1], [], []>} : vector<8x128xf32>, vector<128x256xf32>, vector<8x256xf32> -> vector<8x256xf32>
    %93 = arith.addf %91, %92 : vector<8x256xf32>
    %94 = vector.extract_strided_slice %93 {offsets = [0, 0], sizes = [8, 128], strides = [1, 1]} : vector<8x256xf32> to vector<8x128xf32>
    %95 = vector.extract_strided_slice %93 {offsets = [0, 128], sizes = [8, 128], strides = [1, 1]} : vector<8x256xf32> to vector<8x128xf32>
    %cst_35 = arith.constant dense<0xFF800000> : vector<8xf32>
    %96 = vector.multi_reduction <maximumf>, %95, %cst_35 [1] : vector<8x128xf32> to vector<8xf32>
    %97 = vector.shape_cast %96 : vector<8xf32> to vector<8x1xf32>
    %98 = vector.broadcast %97 : vector<8x1xf32> to vector<8x128xf32>
    %99 = arith.subf %95, %98 : vector<8x128xf32>
    %100 = math.exp %99 : vector<8x128xf32>
    %cst_36 = arith.constant dense<0.000000e+00> : vector<8xf32>
    %101 = vector.multi_reduction <add>, %100, %cst_36 [1] : vector<8x128xf32> to vector<8xf32>
    %102 = vector.shape_cast %101 : vector<8xf32> to vector<8x1xf32>
    %103 = math.log %102 : vector<8x1xf32>
    %104 = vector.broadcast %103 : vector<8x1xf32> to vector<8x128xf32>
    %105 = arith.subf %99, %104 : vector<8x128xf32>
    %106 = arith.index_cast %c4_i32 : i32 to index
    %c0_37 = arith.constant 0 : index
    %c0_38 = arith.constant 0 : index
    %107 = vector.load %arg4[%106, %c0_37, %c0_38] : memref<8x8x128xf32, #tpu.memory_space<vmem>>, vector<1x8x128xf32>
    %108 = vector.shape_cast %107 : vector<1x8x128xf32> to vector<8x128xf32>
    %109 = vector.shape_cast %105 : vector<8x128xf32> to vector<1x8x128xf32>
    tpu.vector_store %arg4[%106, %c0_37, %c0_38], %109 {strides = array<i32>} : memref<8x8x128xf32, #tpu.memory_space<vmem>>, vector<1x8x128xf32>,
    %c5_i32 = arith.constant 5 : i32
    %110 = arith.index_cast %c5_i32 : i32 to index
    %c0_39 = arith.constant 0 : index
    %c0_40 = arith.constant 0 : index
    %111 = vector.load %arg1[%110, %c0_39, %c0_40] : memref<8x8x256xf32, #tpu.memory_space<vmem>>, vector<1x8x256xf32>
    %112 = vector.shape_cast %111 : vector<1x8x256xf32> to vector<8x256xf32>
    %cst_41 = arith.constant dense<0.000000e+00> : vector<8x256xf32>
    %113 = tpu.matmul %94, %3, %cst_41 {dimension_numbers = #tpu.dot_dimension_numbers<[1], [0], [0], [1], [0, 0, 1, 1], [], []>} : vector<8x128xf32>, vector<128x256xf32>, vector<8x256xf32> -> vector<8x256xf32>
    %114 = arith.addf %112, %113 : vector<8x256xf32>
    %115 = vector.extract_strided_slice %114 {offsets = [0, 0], sizes = [8, 128], strides = [1, 1]} : vector<8x256xf32> to vector<8x128xf32>
    %116 = vector.extract_strided_slice %114 {offsets = [0, 128], sizes = [8, 128], strides = [1, 1]} : vector<8x256xf32> to vector<8x128xf32>
    %cst_42 = arith.constant dense<0xFF800000> : vector<8xf32>
    %117 = vector.multi_reduction <maximumf>, %116, %cst_42 [1] : vector<8x128xf32> to vector<8xf32>
    %118 = vector.shape_cast %117 : vector<8xf32> to vector<8x1xf32>
    %119 = vector.broadcast %118 : vector<8x1xf32> to vector<8x128xf32>
    %120 = arith.subf %116, %119 : vector<8x128xf32>
    %121 = math.exp %120 : vector<8x128xf32>
    %cst_43 = arith.constant dense<0.000000e+00> : vector<8xf32>
    %122 = vector.multi_reduction <add>, %121, %cst_43 [1] : vector<8x128xf32> to vector<8xf32>
    %123 = vector.shape_cast %122 : vector<8xf32> to vector<8x1xf32>
    %124 = math.log %123 : vector<8x1xf32>
    %125 = vector.broadcast %124 : vector<8x1xf32> to vector<8x128xf32>
    %126 = arith.subf %120, %125 : vector<8x128xf32>
    %127 = arith.index_cast %c5_i32 : i32 to index
    %c0_44 = arith.constant 0 : index
    %c0_45 = arith.constant 0 : index
    %128 = vector.load %arg4[%127, %c0_44, %c0_45] : memref<8x8x128xf32, #tpu.memory_space<vmem>>, vector<1x8x128xf32>
    %129 = vector.shape_cast %128 : vector<1x8x128xf32> to vector<8x128xf32>
    %130 = vector.shape_cast %126 : vector<8x128xf32> to vector<1x8x128xf32>
    tpu.vector_store %arg4[%127, %c0_44, %c0_45], %130 {strides = array<i32>} : memref<8x8x128xf32, #tpu.memory_space<vmem>>, vector<1x8x128xf32>,
    %c6_i32 = arith.constant 6 : i32
    %131 = arith.index_cast %c6_i32 : i32 to index
    %c0_46 = arith.constant 0 : index
    %c0_47 = arith.constant 0 : index
    %132 = vector.load %arg1[%131, %c0_46, %c0_47] : memref<8x8x256xf32, #tpu.memory_space<vmem>>, vector<1x8x256xf32>
    %133 = vector.shape_cast %132 : vector<1x8x256xf32> to vector<8x256xf32>
    %cst_48 = arith.constant dense<0.000000e+00> : vector<8x256xf32>
    %134 = tpu.matmul %115, %3, %cst_48 {dimension_numbers = #tpu.dot_dimension_numbers<[1], [0], [0], [1], [0, 0, 1, 1], [], []>} : vector<8x128xf32>, vector<128x256xf32>, vector<8x256xf32> -> vector<8x256xf32>
    %135 = arith.addf %133, %134 : vector<8x256xf32>
    %136 = vector.extract_strided_slice %135 {offsets = [0, 0], sizes = [8, 128], strides = [1, 1]} : vector<8x256xf32> to vector<8x128xf32>
    %137 = vector.extract_strided_slice %135 {offsets = [0, 128], sizes = [8, 128], strides = [1, 1]} : vector<8x256xf32> to vector<8x128xf32>
    %cst_49 = arith.constant dense<0xFF800000> : vector<8xf32>
    %138 = vector.multi_reduction <maximumf>, %137, %cst_49 [1] : vector<8x128xf32> to vector<8xf32>
    %139 = vector.shape_cast %138 : vector<8xf32> to vector<8x1xf32>
    %140 = vector.broadcast %139 : vector<8x1xf32> to vector<8x128xf32>
    %141 = arith.subf %137, %140 : vector<8x128xf32>
    %142 = math.exp %141 : vector<8x128xf32>
    %cst_50 = arith.constant dense<0.000000e+00> : vector<8xf32>
    %143 = vector.multi_reduction <add>, %142, %cst_50 [1] : vector<8x128xf32> to vector<8xf32>
    %144 = vector.shape_cast %143 : vector<8xf32> to vector<8x1xf32>
    %145 = math.log %144 : vector<8x1xf32>
    %146 = vector.broadcast %145 : vector<8x1xf32> to vector<8x128xf32>
    %147 = arith.subf %141, %146 : vector<8x128xf32>
    %148 = arith.index_cast %c6_i32 : i32 to index
    %c0_51 = arith.constant 0 : index
    %c0_52 = arith.constant 0 : index
    %149 = vector.load %arg4[%148, %c0_51, %c0_52] : memref<8x8x128xf32, #tpu.memory_space<vmem>>, vector<1x8x128xf32>
    %150 = vector.shape_cast %149 : vector<1x8x128xf32> to vector<8x128xf32>
    %151 = vector.shape_cast %147 : vector<8x128xf32> to vector<1x8x128xf32>
    tpu.vector_store %arg4[%148, %c0_51, %c0_52], %151 {strides = array<i32>} : memref<8x8x128xf32, #tpu.memory_space<vmem>>, vector<1x8x128xf32>,
    %c7_i32 = arith.constant 7 : i32
    %152 = arith.index_cast %c7_i32 : i32 to index
    %c0_53 = arith.constant 0 : index
    %c0_54 = arith.constant 0 : index
    %153 = vector.load %arg1[%152, %c0_53, %c0_54] : memref<8x8x256xf32, #tpu.memory_space<vmem>>, vector<1x8x256xf32>
    %154 = vector.shape_cast %153 : vector<1x8x256xf32> to vector<8x256xf32>
    %cst_55 = arith.constant dense<0.000000e+00> : vector<8x256xf32>
    %155 = tpu.matmul %136, %3, %cst_55 {dimension_numbers = #tpu.dot_dimension_numbers<[1], [0], [0], [1], [0, 0, 1, 1], [], []>} : vector<8x128xf32>, vector<128x256xf32>, vector<8x256xf32> -> vector<8x256xf32>
    %156 = arith.addf %154, %155 : vector<8x256xf32>
    %157 = vector.extract_strided_slice %156 {offsets = [0, 0], sizes = [8, 128], strides = [1, 1]} : vector<8x256xf32> to vector<8x128xf32>
    %158 = vector.extract_strided_slice %156 {offsets = [0, 128], sizes = [8, 128], strides = [1, 1]} : vector<8x256xf32> to vector<8x128xf32>
    %cst_56 = arith.constant dense<0xFF800000> : vector<8xf32>
    %159 = vector.multi_reduction <maximumf>, %158, %cst_56 [1] : vector<8x128xf32> to vector<8xf32>
    %160 = vector.shape_cast %159 : vector<8xf32> to vector<8x1xf32>
    %161 = vector.broadcast %160 : vector<8x1xf32> to vector<8x128xf32>
    %162 = arith.subf %158, %161 : vector<8x128xf32>
    %163 = math.exp %162 : vector<8x128xf32>
    %cst_57 = arith.constant dense<0.000000e+00> : vector<8xf32>
    %164 = vector.multi_reduction <add>, %163, %cst_57 [1] : vector<8x128xf32> to vector<8xf32>
    %165 = vector.shape_cast %164 : vector<8xf32> to vector<8x1xf32>
    %166 = math.log %165 : vector<8x1xf32>
    %167 = vector.broadcast %166 : vector<8x1xf32> to vector<8x128xf32>
    %168 = arith.subf %162, %167 : vector<8x128xf32>
    %169 = arith.index_cast %c7_i32 : i32 to index
    %c0_58 = arith.constant 0 : index
    %c0_59 = arith.constant 0 : index
    %170 = vector.load %arg4[%169, %c0_58, %c0_59] : memref<8x8x128xf32, #tpu.memory_space<vmem>>, vector<1x8x128xf32>
    %171 = vector.shape_cast %170 : vector<1x8x128xf32> to vector<8x128xf32>
    %172 = vector.shape_cast %168 : vector<8x128xf32> to vector<1x8x128xf32>
    tpu.vector_store %arg4[%169, %c0_58, %c0_59], %172 {strides = array<i32>} : memref<8x8x128xf32, #tpu.memory_space<vmem>>, vector<1x8x128xf32>,
    %c8_i32 = arith.constant 8 : i32
    %c0_60 = arith.constant 0 : index
    %c0_61 = arith.constant 0 : index
    %173 = vector.load %arg6[%c0_60, %c0_61] : memref<8x128xf32, #tpu.memory_space<vmem>>, vector<8x128xf32>
    tpu.vector_store %arg6[%c0_60, %c0_61], %157 {strides = array<i32>} : memref<8x128xf32, #tpu.memory_space<vmem>>, vector<8x128xf32>,
    %c1_i32_62 = arith.constant 1 : i32
    %174 = arith.cmpi eq, %arg0, %c1_i32_62 : i32
    %175 = arith.extui %174 : i1 to i32
    %c0_i32_63 = arith.constant 0 : i32
    %176 = arith.cmpi ne, %175, %c0_i32_63 : i32
    scf.if %176 {
      %c0_64 = arith.constant 0 : index
      %c0_65 = arith.constant 0 : index
      %177 = vector.load %arg5[%c0_64, %c0_65] : memref<8x128xf32, #tpu.memory_space<vmem>>, vector<8x128xf32>
      tpu.vector_store %arg5[%c0_64, %c0_65], %157 {strides = array<i32>} : memref<8x128xf32, #tpu.memory_space<vmem>>, vector<8x128xf32>,
    } else {
    }
    return
  }
  func.func @transform_0(%arg0: i32) -> (i32, i32, i32) {
    %c0_i32 = arith.constant 0 : i32
    %c0_i32_0 = arith.constant 0 : i32
    %c0_i32_1 = arith.constant 0 : i32
    return %arg0, %c0_i32, %c0_i32_0 : i32, i32, i32
  }
  func.func @transform_1(%arg0: i32) -> (i32, i32) {
    %c0_i32 = arith.constant 0 : i32
    %c0_i32_0 = arith.constant 0 : i32
    %c0_i32_1 = arith.constant 0 : i32
    return %c0_i32, %c0_i32_0 : i32, i32
  }
  func.func @transform_2(%arg0: i32) -> (i32, i32) {
    %c0_i32 = arith.constant 0 : i32
    %c0_i32_0 = arith.constant 0 : i32
    %c0_i32_1 = arith.constant 0 : i32
    return %c0_i32, %c0_i32_0 : i32, i32
  }
  func.func @transform_3(%arg0: i32) -> (i32, i32, i32) {
    %c0_i32 = arith.constant 0 : i32
    %c0_i32_0 = arith.constant 0 : i32
    %c0_i32_1 = arith.constant 0 : i32
    return %arg0, %c0_i32, %c0_i32_0 : i32, i32, i32
  }
  func.func @transform_4(%arg0: i32) -> (i32, i32) {
    %c0_i32 = arith.constant 0 : i32
    %c0_i32_0 = arith.constant 0 : i32
    %c0_i32_1 = arith.constant 0 : i32
    return %c0_i32, %c0_i32_0 : i32, i32
  }
}

</mosaic_0001>

<bundles_post_ra>
// kernel: rnn_sequence_forward.1
= control target key start
LH: loop header
LB: loop body
LE: loop exit
PB: predicated region body
PF: predicated region fallthrough
CT: control target
= control target key end

     0   :  { %10 = vsyncpa [#allocation4], 0  ;;  %s1879_s0 = inlined_call_operand.vmem [shape: f32[16,8,256], index: 0, kind: input, shape index: {}]   ;;  %s1880_s1 = inlined_call_operand.vmem [shape: f32[8,128], index: 1, kind: input, shape index: {}]   ;;  %s1881_s2 = inlined_call_operand.vmem [shape: f32[128,256], index: 2, kind: input, shape index: {}]   ;;  %s1882_s3 = inlined_call_operand.hbm [shape: f32[16,8,128], index: 3, kind: output, shape index: {0}]   ;;  %s1883_s4 = inlined_call_operand.hbm [shape: f32[8,128], index: 4, kind: output, shape index: {1}]  }
   0x1   :  { %12 = vsyncpa [#allocation4 + $0x1], 0 }
   0x2   :  { %13 = vsyncpa [#allocation6], 0  ;;  %s1287_s15 = smov 0   ;;  %s1289_s16 = smov 0  }
   0x3   :  { %s1291_s17 = smov 0   ;;  %s1293_s18 = smov 0  }
   0x4 LB: > { %s1308_s19 = sadd.s32 4294967295, %s1255_s18   ;;  %s1046_s20 = sadd.s32 4294967294, %s1255_s18   ;;  %s1255_s18 = sphi %s1293_s18, %s1889_s18   ;;  %s1251_s17 = sphi %s1291_s17, %s1888_s17   ;;  %s1247_s16 = sphi %s1289_s16, %s1887_s16   ;;  %s1243_s15 = sphi %s1287_s15, %s1886_s15  }
   0x5   : > { %s1312_s21 = sadd.s32 1, %s1255_s18   ;;  %s94_s22 = sadd.s32 1, %s1251_s17 }
   0x6   : > { %s91_s23 = ssub.s32 %s1255_s18, %s1312_s21  ;;  %p104_p0 = scmp.ne.s32.totalorder %s1251_s17, %s1247_s16 }
   0x7   : > { %p92_p1 = scmp.eq.s32.totalorder %s91_s23, 0  ;;  %p105_p2 = scmp.eq.s32.totalorder %s1308_s19, 1 }
   0x8   : > { %p110_p3 = scmp.ne.s32.totalorder %s1247_s16, %s1243_s15  ;;  %p111_p4 = scmp.eq.s32.totalorder %s1046_s20, 1 }
   0x9   : > { %s1323_s24 = scalar_select %p92_p1, %s1251_s17, %s94_s22  }
   0xa   : > { %p1327_p5 = por %p105_p2, %p104_p0  ;;  %p1331_p6 = por %p111_p4, %p110_p3 }
   0xb   : > { %p1049_p7 = scmp.ge.s32.totalorder %s1255_s18, 1  ;;  %p166_p8 = scmp.lt.s32.totalorder %s1255_s18, 3 }
   0xd   : > { %p167_p9 = pnand %p1049_p7, %p166_p8 }
   0xe   : > { %s188_s27 = sand.u32 (!%p167_p9), 1, %s1247_s16   ;;  %s1051_s28 = sshll.u32 (!%p167_p9), %s1308_s19, 3 }
   0xf   : > { %170 = sbr.rel (%p167_p9) target bundleno = 1975 (0x7b7), region = 32  ;;  %s1050_s29 = sshll.u32 (!%p167_p9), %s188_s27, 6 }
  0x10   : > { %p194_p10 = scmp.lt.s32.totalorder (!%p167_p9), %s1051_s28, 15  ;;  %s1346_s8 = scalar_lea.vmem (!%p167_p9), [#allocation3], %s1050_s29 }
  0x11   : > { %p1054_p11 = scmp.ne.s32.totalorder (!%p167_p9), %s1308_s19, 0 }
  0x14   : > { %s1891_s28 = smov (!%p194_p10, %s1051_s28), 15  ;;  %204 = sbr.rel (%p1054_p11) target bundleno = 27 (0x1b), region = 36 }
  0x15   : > { %s1084_s30 = sshll.u32 %s1891_s28, 4 }
  0x16   : > { %s1344_s7 = scalar_lea.vmem %s1879_s0, %s1084_s30 }
  0x19   : > { %v205_v0 = vld [vmem:[%s1880_s1] sm:$0xff] }
  0x1a   : > { %206 = vst [vmem:[#allocation2] sm:$0xff] %v205_v0 }
  0x1b PF: > { %v1355_v1 = vld [vmem:[%s1881_s2 + $0xf8] sm:$0xff]  ;;  %v1360_v2 = vld [vmem:[%s1881_s2 + $0xf0] sm:$0xff]  ;;  %v1365_v3 = vld [vmem:[%s1881_s2 + $0xe8] sm:$0xff]  ;;  %v1257_v5 = vmov 0.0   ;;  %p1076_p12 = scmp.ne.s32.totalorder %s1308_s19, 1 }
  0x1c   : > { %242 = vmatprep.subr.mxu0 %v1355_v1  ;;  %v1371_v4 = vld [vmem:[%s1881_s2 + $0xe0] sm:$0xff]  ;;  %306 = vmatprep.mubr.f32.mxu0 %v1257_v5  ;;  %v1378_v6 = vld [vmem:[%s1881_s2 + $0xd8] sm:$0xff]  ;;  %v1385_v7 = vld [vmem:[%s1881_s2 + $0xd0] sm:$0xff] }
  0x1d   : > { %243 = vmatpush1.msra.mxu0 %v1360_v2  ;;  %329 = vmatprep.subr.mxu1 %v1355_v1  ;;  %v1392_v8 = vld [vmem:[%s1881_s2 + $0xc8] sm:$0xff]  ;;  %v1399_v9 = vld [vmem:[%s1881_s2 + $0xc0] sm:$0xff]  ;;  %v1406_v10 = vld [vmem:[%s1881_s2 + $0xb8] sm:$0xff] }
  0x1e   : > { %244 = vmatprep.subr.mxu0 %v1365_v3  ;;  %330 = vmatpush1.msra.mxu1 %v1360_v2  ;;  %v1413_v11 = vld [vmem:[%s1881_s2 + $0xb0] sm:$0xff]  ;;  %v1420_v12 = vld [vmem:[%s1881_s2 + $0xa8] sm:$0xff]  ;;  %v1427_v13 = vld [vmem:[%s1881_s2 + $0xa0] sm:$0xff] }
  0x1f   : > { %245 = vmatpush1.msra.mxu0 %v1371_v4  ;;  %331 = vmatprep.subr.mxu1 %v1365_v3  ;;  %v1434_v14 = vld [vmem:[%s1881_s2 + $0x98] sm:$0xff]  ;;  %v1441_v15 = vld [vmem:[%s1881_s2 + $0x90] sm:$0xff]  ;;  %v1448_v16 = vld [vmem:[%s1881_s2 + $0x88] sm:$0xff] }
  0x20   : > { %246 = vmatprep.subr.mxu0 %v1378_v6  ;;  %332 = vmatpush1.msra.mxu1 %v1371_v4  ;;  %v1455_v17 = vld [vmem:[%s1881_s2 + $0x80] sm:$0xff]  ;;  %v1462_v18 = vld [vmem:[%s1881_s2 + $0x78] sm:$0xff]  ;;  %v1469_v19 = vld [vmem:[%s1881_s2 + $0x70] sm:$0xff] }
  0x21   : > { %247 = vmatpush1.msra.mxu0 %v1385_v7  ;;  %333 = vmatprep.subr.mxu1 %v1378_v6  ;;  %v1476_v20 = vld [vmem:[%s1881_s2 + $0x68] sm:$0xff]  ;;  %v1483_v21 = vld [vmem:[%s1881_s2 + $0x60] sm:$0xff]  ;;  %v1490_v22 = vld [vmem:[%s1881_s2 + $0x58] sm:$0xff] }
  0x22   : > { %248 = vmatprep.subr.mxu0 %v1392_v8  ;;  %334 = vmatpush1.msra.mxu1 %v1385_v7  ;;  %v1497_v23 = vld [vmem:[%s1881_s2 + $0x50] sm:$0xff]  ;;  %v1504_v24 = vld [vmem:[%s1881_s2 + $0x48] sm:$0xff]  ;;  %v1511_v25 = vld [vmem:[%s1881_s2 + $0x40] sm:$0xff] }
  0x23   : > { %249 = vmatpush1.msra.mxu0 %v1399_v9  ;;  %335 = vmatprep.subr.mxu1 %v1392_v8  ;;  %v1518_v26 = vld [vmem:[%s1881_s2 + $0x38] sm:$0xff]  ;;  %v1525_v27 = vld [vmem:[%s1881_s2 + $0x30] sm:$0xff]  ;;  %v1532_v28 = vld [vmem:[%s1881_s2 + $0x28] sm:$0xff] }
  0x24   : > { %250 = vmatprep.subr.mxu0 %v1406_v10  ;;  %336 = vmatpush1.msra.mxu1 %v1399_v9  ;;  %v1539_v29 = vld [vmem:[%s1881_s2 + $0x20] sm:$0xff]  ;;  %v1546_v30 = vld [vmem:[%s1881_s2 + $0x18] sm:$0xff]  ;;  %v1553_v31 = vld [vmem:[%s1881_s2 + $0x10] sm:$0xff] }
  0x25   : > { %251 = vmatpush1.msra.mxu0 %v1413_v11  ;;  %337 = vmatprep.subr.mxu1 %v1406_v10  ;;  %v1560_v32 = vld [vmem:[%s1881_s2 + $0x8] sm:$0xff]  ;;  %v1567_v33 = vld [vmem:[%s1881_s2] sm:$0xff]  ;;  %v1055_v41 = vld [vmem:[%s1344_s7 + $0x10] sm:$0xff] }
  0x26   : > { %252 = vmatprep.subr.mxu0 %v1420_v12  ;;  %338 = vmatpush1.msra.mxu1 %v1413_v11  ;;  %v239_v34 = vld [vmem:[#allocation2] sm:$0xff]  ;;  %v241_v37 = vld [vmem:[%s1344_s7 + $0x8] sm:$0xff]  ;;  %v1056_v43 = vld [vmem:[%s1344_s7 + $0x18] sm:$0xff] }
  0x27   : > { %253 = vmatpush1.msra.mxu0 %v1427_v13  ;;  %339 = vmatprep.subr.mxu1 %v1420_v12  ;;  %v240_v35 = vld [vmem:[%s1344_s7] sm:$0xff]  ;;  %v1059_v49 = vld [vmem:[%s1344_s7 + $0x28] sm:$0xff]  ;;  %v1061_v53 = vld [vmem:[%s1344_s7 + $0x30] sm:$0xff] }
  0x28   : > { %254 = vmatprep.subr.mxu0 %v1434_v14  ;;  %340 = vmatpush1.msra.mxu1 %v1427_v13  ;;  %v1058_v47 = vld [vmem:[%s1344_s7 + $0x20] sm:$0xff]  ;;  %v1062_v55 = vld [vmem:[%s1344_s7 + $0x38] sm:$0xff]  ;;  %v1065_v61 = vld [vmem:[%s1344_s7 + $0x48] sm:$0xff] }
  0x29   : > { %255 = vmatpush1.msra.mxu0 %v1441_v15  ;;  %341 = vmatprep.subr.mxu1 %v1434_v14  ;;  %v1064_v59 = vld [vmem:[%s1344_s7 + $0x40] sm:$0xff] }
  0x2a   : > { %256 = vmatprep.subr.mxu0 %v1448_v16  ;;  %342 = vmatpush1.msra.mxu1 %v1441_v15 }
  0x2b   : > { %257 = vmatpush1.msra.mxu0 %v1455_v17  ;;  %343 = vmatprep.subr.mxu1 %v1448_v16 }
  0x2c   : > { %258 = vmatprep.subr.mxu0 %v1462_v18  ;;  %344 = vmatpush1.msra.mxu1 %v1455_v17 }
  0x2d   : > { %259 = vmatpush1.msra.mxu0 %v1469_v19  ;;  %345 = vmatprep.subr.mxu1 %v1462_v18 }
  0x2e   : > { %260 = vmatprep.subr.mxu0 %v1476_v20  ;;  %346 = vmatpush1.msra.mxu1 %v1469_v19 }
  0x2f   : > { %261 = vmatpush1.msra.mxu0 %v1483_v21  ;;  %347 = vmatprep.subr.mxu1 %v1476_v20 }
  0x30   : > { %262 = vmatprep.subr.mxu0 %v1490_v22  ;;  %348 = vmatpush1.msra.mxu1 %v1483_v21 }
  0x31   : > { %263 = vmatpush1.msra.mxu0 %v1497_v23  ;;  %349 = vmatprep.subr.mxu1 %v1490_v22 }
  0x32   : > { %264 = vmatprep.subr.mxu0 %v1504_v24  ;;  %350 = vmatpush1.msra.mxu1 %v1497_v23 }
  0x33   : > { %265 = vmatpush1.msra.mxu0 %v1511_v25  ;;  %351 = vmatprep.subr.mxu1 %v1504_v24 }
  0x34   : > { %266 = vmatprep.subr.mxu0 %v1518_v26  ;;  %352 = vmatpush1.msra.mxu1 %v1511_v25 }
  0x35   : > { %267 = vmatpush1.msra.mxu0 %v1525_v27  ;;  %353 = vmatprep.subr.mxu1 %v1518_v26 }
  0x36   : > { %268 = vmatprep.subr.mxu0 %v1532_v28  ;;  %354 = vmatpush1.msra.mxu1 %v1525_v27 }
  0x37   : > { %269 = vmatpush1.msra.mxu0 %v1539_v29  ;;  %355 = vmatprep.subr.mxu1 %v1532_v28 }
  0x38   : > { %270 = vmatprep.subr.mxu0 %v1546_v30  ;;  %356 = vmatpush1.msra.mxu1 %v1539_v29 }
  0x39   : > { %271 = vmatpush1.msra.mxu0 %v1553_v31  ;;  %357 = vmatprep.subr.mxu1 %v1546_v30 }
  0x3a   : > { %272 = vmatprep.subr.mxu0 %v1560_v32  ;;  %358 = vmatpush1.msra.mxu1 %v1553_v31 }
  0x3b   : > { %273 = vmatpush1.msra.mxu0 %v1567_v33  ;;  %359 = vmatprep.subr.mxu1 %v1560_v32 }
  0x3c   : > { %307 = vmatmul.mubr.f32.vlgmr.msra.gmra.mxu0 %v239_v34  ;;  %360 = vmatpush1.msra.mxu1 %v1567_v33 }
  0x3d   : > { %393 = vmatprep.mubr.f32.mxu1 %v1257_v5  ;;  %417 = vmatprep.subr.mxu0 %v1355_v1 }
  0x3e   : > { %418 = vmatpush1.msra.mxu0 %v1360_v2  ;;  %481 = vmatprep.mubr.f32.mxu0 %v1257_v5 }
  0x3f   : > { %419 = vmatprep.subr.mxu0 %v1365_v3  ;;  %505 = vmatprep.subr.mxu1 %v1355_v1 }
  0x40   : > { %420 = vmatpush1.msra.mxu0 %v1371_v4 }
  0x41   : > { %421 = vmatprep.subr.mxu0 %v1378_v6 }
  0x42   : > { %422 = vmatpush1.msra.mxu0 %v1385_v7 }
  0x43   : > { %423 = vmatprep.subr.mxu0 %v1392_v8 }
  0x44   : > { %424 = vmatpush1.msra.mxu0 %v1399_v9 }
  0x45   : > { %425 = vmatprep.subr.mxu0 %v1406_v10 }
  0x46   : > { %426 = vmatpush1.msra.mxu0 %v1413_v11 }
  0x47   : > { %427 = vmatprep.subr.mxu0 %v1420_v12 }
  0x48   : > { %428 = vmatpush1.msra.mxu0 %v1427_v13 }
  0x49   : > { %429 = vmatprep.subr.mxu0 %v1434_v14 }
  0x4a   : > { %430 = vmatpush1.msra.mxu0 %v1441_v15 }
  0x4b   : > { %431 = vmatprep.subr.mxu0 %v1448_v16 }
  0x4c   : > { %432 = vmatpush1.msra.mxu0 %v1455_v17 }
  0x4d   : > { %433 = vmatprep.subr.mxu0 %v1462_v18 }
  0x4e   : > { %434 = vmatpush1.msra.mxu0 %v1469_v19 }
  0x4f   : > { %435 = vmatprep.subr.mxu0 %v1476_v20 }
  0x50   : > { %436 = vmatpush1.msra.mxu0 %v1483_v21 }
  0x51   : > { %437 = vmatprep.subr.mxu0 %v1490_v22 }
  0x52   : > { %438 = vmatpush1.msra.mxu0 %v1497_v23 }
  0x53   : > { %439 = vmatprep.subr.mxu0 %v1504_v24 }
  0x54   : > { %440 = vmatpush1.msra.mxu0 %v1511_v25 }
  0x55   : > { %441 = vmatprep.subr.mxu0 %v1518_v26 }
  0x56   : > { %442 = vmatpush1.msra.mxu0 %v1525_v27 }
  0x57   : > { %443 = vmatprep.subr.mxu0 %v1532_v28 }
  0x58   : > { %444 = vmatpush1.msra.mxu0 %v1539_v29 }
  0x59   : > { %445 = vmatprep.subr.mxu0 %v1546_v30 }
  0x5a   : > { %446 = vmatpush1.msra.mxu0 %v1553_v31 }
  0x5b   : > { %447 = vmatprep.subr.mxu0 %v1560_v32 }
  0x5c   : > { %448 = vmatpush1.msra.mxu0 %v1567_v33 }
  0x5d   : > { %593 = vmatprep.subr.mxu0 %v1355_v1 }
  0xfc   : > { %v308_v36 = vpop.f32.mrf.mxu0 }
  0xfd   : > { %v313_v38 = vadd.f32 %v308_v36, %v240_v35 }
  0xfe   : > { %v310_v39 = vpop.f32.mrf.mxu0 }
  0xff   : > { %v1615_v40 = vadd.f32 %v310_v39, %v241_v37  ;;  %394 = vmatmul.mubr.f32.vlgmr.msra.gmra.mxu1 %v313_v38 }
 0x100   : > { %506 = vmatpush1.msra.mxu1 %v1360_v2  ;;  %569 = vmatprep.mubr.f32.mxu1 %v1257_v5 }
 0x101   : > { %315 = vmax.xlane.f32.xlu0 %v1615_v40  ;;  %507 = vmatprep.subr.mxu1 %v1365_v3 }
 0x102   : > { %508 = vmatpush1.msra.mxu1 %v1371_v4 }
 0x103   : > { %509 = vmatprep.subr.mxu1 %v1378_v6 }
 0x104   : > { %510 = vmatpush1.msra.mxu1 %v1385_v7 }
 0x105   : > { %511 = vmatprep.subr.mxu1 %v1392_v8 }
 0x106   : > { %512 = vmatpush1.msra.mxu1 %v1399_v9 }
 0x107   : > { %513 = vmatprep.subr.mxu1 %v1406_v10 }
 0x108   : > { %514 = vmatpush1.msra.mxu1 %v1413_v11 }
 0x109   : > { %515 = vmatprep.subr.mxu1 %v1420_v12 }
 0x10a   : > { %516 = vmatpush1.msra.mxu1 %v1427_v13 }
 0x10b   : > { %517 = vmatprep.subr.mxu1 %v1434_v14 }
 0x10c   : > { %518 = vmatpush1.msra.mxu1 %v1441_v15 }
 0x10d   : > { %519 = vmatprep.subr.mxu1 %v1448_v16 }
 0x10e   : > { %520 = vmatpush1.msra.mxu1 %v1455_v17 }
 0x10f   : > { %521 = vmatprep.subr.mxu1 %v1462_v18 }
 0x110   : > { %522 = vmatpush1.msra.mxu1 %v1469_v19 }
 0x111   : > { %523 = vmatprep.subr.mxu1 %v1476_v20 }
 0x112   : > { %524 = vmatpush1.msra.mxu1 %v1483_v21 }
 0x113   : > { %525 = vmatprep.subr.mxu1 %v1490_v22 }
 0x114   : > { %526 = vmatpush1.msra.mxu1 %v1497_v23 }
 0x115   : > { %527 = vmatprep.subr.mxu1 %v1504_v24 }
 0x116   : > { %528 = vmatpush1.msra.mxu1 %v1511_v25 }
 0x117   : > { %529 = vmatprep.subr.mxu1 %v1518_v26 }
 0x118   : > { %530 = vmatpush1.msra.mxu1 %v1525_v27 }
 0x119   : > { %531 = vmatprep.subr.mxu1 %v1532_v28 }
 0x11a   : > { %532 = vmatpush1.msra.mxu1 %v1539_v29 }
 0x11b   : > { %533 = vmatprep.subr.mxu1 %v1546_v30 }
 0x11c   : > { %534 = vmatpush1.msra.mxu1 %v1553_v31 }
 0x11d   : > { %535 = vmatprep.subr.mxu1 %v1560_v32 }
 0x11e   : > { %536 = vmatpush1.msra.mxu1 %v1567_v33 }
 0x11f   : > { %681 = vmatprep.subr.mxu1 %v1355_v1 }
 0x1bf   : > { %v395_v42 = vpop.f32.mrf.mxu1 }
 0x1c0   : > { %v400_v44 = vadd.f32 %v1055_v41, %v395_v42 }
 0x1c1   : > { %v397_v45 = vpop.f32.mrf.mxu1 }
 0x1c2   : > { %v1653_v46 = vadd.f32 %v1056_v43, %v397_v45  ;;  %482 = vmatmul.mubr.f32.vlgmr.msra.gmra.mxu0 %v400_v44 }
 0x1c3   : > { %594 = vmatpush1.msra.mxu0 %v1360_v2  ;;  %657 = vmatprep.mubr.f32.mxu0 %v1257_v5 }
 0x1c4   : > { %402 = vmax.xlane.f32.xlu0 %v1653_v46  ;;  %595 = vmatprep.subr.mxu0 %v1365_v3 }
 0x1c5   : > { %596 = vmatpush1.msra.mxu0 %v1371_v4 }
 0x1c6   : > { %597 = vmatprep.subr.mxu0 %v1378_v6 }
 0x1c7   : > { %598 = vmatpush1.msra.mxu0 %v1385_v7 }
 0x1c8   : > { %599 = vmatprep.subr.mxu0 %v1392_v8 }
 0x1c9   : > { %600 = vmatpush1.msra.mxu0 %v1399_v9 }
 0x1ca   : > { %601 = vmatprep.subr.mxu0 %v1406_v10 }
 0x1cb   : > { %602 = vmatpush1.msra.mxu0 %v1413_v11 }
 0x1cc   : > { %603 = vmatprep.subr.mxu0 %v1420_v12 }
 0x1cd   : > { %604 = vmatpush1.msra.mxu0 %v1427_v13 }
 0x1ce   : > { %605 = vmatprep.subr.mxu0 %v1434_v14 }
 0x1cf   : > { %606 = vmatpush1.msra.mxu0 %v1441_v15 }
 0x1d0   : > { %607 = vmatprep.subr.mxu0 %v1448_v16 }
 0x1d1   : > { %608 = vmatpush1.msra.mxu0 %v1455_v17 }
 0x1d2   : > { %609 = vmatprep.subr.mxu0 %v1462_v18 }
 0x1d3   : > { %610 = vmatpush1.msra.mxu0 %v1469_v19 }
 0x1d4   : > { %611 = vmatprep.subr.mxu0 %v1476_v20 }
 0x1d5   : > { %612 = vmatpush1.msra.mxu0 %v1483_v21 }
 0x1d6   : > { %613 = vmatprep.subr.mxu0 %v1490_v22 }
 0x1d7   : > { %614 = vmatpush1.msra.mxu0 %v1497_v23 }
 0x1d8   : > { %615 = vmatprep.subr.mxu0 %v1504_v24 }
 0x1d9   : > { %616 = vmatpush1.msra.mxu0 %v1511_v25 }
 0x1da   : > { %617 = vmatprep.subr.mxu0 %v1518_v26 }
 0x1db   : > { %618 = vmatpush1.msra.mxu0 %v1525_v27 }
 0x1dc   : > { %619 = vmatprep.subr.mxu0 %v1532_v28 }
 0x1dd   : > { %620 = vmatpush1.msra.mxu0 %v1539_v29 }
 0x1de   : > { %621 = vmatprep.subr.mxu0 %v1546_v30 }
 0x1df   : > { %622 = vmatpush1.msra.mxu0 %v1553_v31 }
 0x1e0   : > { %623 = vmatprep.subr.mxu0 %v1560_v32 }
 0x1e1   : > { %624 = vmatpush1.msra.mxu0 %v1567_v33 }
 0x1e2   : > { %769 = vmatprep.subr.mxu0 %v1355_v1 }
 0x282   : > { %v483_v48 = vpop.f32.mrf.mxu0 }
 0x283   : > { %v488_v50 = vadd.f32 %v1058_v47, %v483_v48 }
 0x284   : > { %v485_v51 = vpop.f32.mrf.mxu0 }
 0x285   : > { %v1691_v52 = vadd.f32 %v1059_v49, %v485_v51  ;;  %570 = vmatmul.mubr.f32.vlgmr.msra.gmra.mxu1 %v488_v50  ;;  %v1073_v50 = vld [vmem:[%s1344_s7 + $0x70] sm:$0xff] }
 0x286   : > { %682 = vmatpush1.msra.mxu1 %v1360_v2  ;;  %745 = vmatprep.mubr.f32.mxu1 %v1257_v5 }
 0x287   : > { %490 = vmax.xlane.f32.xlu1 %v1691_v52  ;;  %683 = vmatprep.subr.mxu1 %v1365_v3 }
 0x288   : > { %684 = vmatpush1.msra.mxu1 %v1371_v4 }
 0x289   : > { %685 = vmatprep.subr.mxu1 %v1378_v6 }
 0x28a   : > { %686 = vmatpush1.msra.mxu1 %v1385_v7 }
 0x28b   : > { %687 = vmatprep.subr.mxu1 %v1392_v8 }
 0x28c   : > { %688 = vmatpush1.msra.mxu1 %v1399_v9 }
 0x28d   : > { %689 = vmatprep.subr.mxu1 %v1406_v10 }
 0x28e   : > { %690 = vmatpush1.msra.mxu1 %v1413_v11 }
 0x28f   : > { %691 = vmatprep.subr.mxu1 %v1420_v12 }
 0x290   : > { %692 = vmatpush1.msra.mxu1 %v1427_v13 }
 0x291   : > { %693 = vmatprep.subr.mxu1 %v1434_v14 }
 0x292   : > { %694 = vmatpush1.msra.mxu1 %v1441_v15 }
 0x293   : > { %695 = vmatprep.subr.mxu1 %v1448_v16 }
 0x294   : > { %696 = vmatpush1.msra.mxu1 %v1455_v17 }
 0x295   : > { %697 = vmatprep.subr.mxu1 %v1462_v18 }
 0x296   : > { %698 = vmatpush1.msra.mxu1 %v1469_v19 }
 0x297   : > { %699 = vmatprep.subr.mxu1 %v1476_v20 }
 0x298   : > { %700 = vmatpush1.msra.mxu1 %v1483_v21 }
 0x299   : > { %701 = vmatprep.subr.mxu1 %v1490_v22 }
 0x29a   : > { %702 = vmatpush1.msra.mxu1 %v1497_v23 }
 0x29b   : > { %703 = vmatprep.subr.mxu1 %v1504_v24 }
 0x29c   : > { %704 = vmatpush1.msra.mxu1 %v1511_v25 }
 0x29d   : > { %705 = vmatprep.subr.mxu1 %v1518_v26 }
 0x29e   : > { %706 = vmatpush1.msra.mxu1 %v1525_v27 }
 0x29f   : > { %707 = vmatprep.subr.mxu1 %v1532_v28 }
 0x2a0   : > { %708 = vmatpush1.msra.mxu1 %v1539_v29 }
 0x2a1   : > { %709 = vmatprep.subr.mxu1 %v1546_v30 }
 0x2a2   : > { %710 = vmatpush1.msra.mxu1 %v1553_v31 }
 0x2a3   : > { %711 = vmatprep.subr.mxu1 %v1560_v32 }
 0x2a4   : > { %712 = vmatpush1.msra.mxu1 %v1567_v33 }
 0x2a5   : > { %857 = vmatprep.subr.mxu1 %v1355_v1  ;;  %v1067_v1 = vld [vmem:[%s1344_s7 + $0x50] sm:$0xff] }
 0x345   : > { %v571_v54 = vpop.f32.mrf.mxu1 }
 0x346   : > { %v576_v56 = vadd.f32 %v1061_v53, %v571_v54  ;;  %v1074_v53 = vld [vmem:[%s1344_s7 + $0x78] sm:$0xff] }
 0x347   : > { %v573_v57 = vpop.f32.mrf.mxu1 }
 0x348   : > { %v1729_v58 = vadd.f32 %v1062_v55, %v573_v57  ;;  %658 = vmatmul.mubr.f32.vlgmr.msra.gmra.mxu0 %v576_v56 }
 0x349   : > { %770 = vmatpush1.msra.mxu0 %v1360_v2  ;;  %833 = vmatprep.mubr.f32.mxu0 %v1257_v5 }
 0x34a   : > { %578 = vmax.xlane.f32.xlu1 %v1729_v58  ;;  %771 = vmatprep.subr.mxu0 %v1365_v3 }
 0x34b   : > { %772 = vmatpush1.msra.mxu0 %v1371_v4 }
 0x34c   : > { %773 = vmatprep.subr.mxu0 %v1378_v6 }
 0x34d   : > { %774 = vmatpush1.msra.mxu0 %v1385_v7 }
 0x34e   : > { %775 = vmatprep.subr.mxu0 %v1392_v8 }
 0x34f   : > { %776 = vmatpush1.msra.mxu0 %v1399_v9 }
 0x350   : > { %777 = vmatprep.subr.mxu0 %v1406_v10 }
 0x351   : > { %778 = vmatpush1.msra.mxu0 %v1413_v11 }
 0x352   : > { %779 = vmatprep.subr.mxu0 %v1420_v12 }
 0x353   : > { %780 = vmatpush1.msra.mxu0 %v1427_v13 }
 0x354   : > { %781 = vmatprep.subr.mxu0 %v1434_v14 }
 0x355   : > { %782 = vmatpush1.msra.mxu0 %v1441_v15 }
 0x356   : > { %783 = vmatprep.subr.mxu0 %v1448_v16 }
 0x357   : > { %784 = vmatpush1.msra.mxu0 %v1455_v17 }
 0x358   : > { %785 = vmatprep.subr.mxu0 %v1462_v18 }
 0x359   : > { %786 = vmatpush1.msra.mxu0 %v1469_v19 }
 0x35a   : > { %787 = vmatprep.subr.mxu0 %v1476_v20 }
 0x35b   : > { %788 = vmatpush1.msra.mxu0 %v1483_v21 }
 0x35c   : > { %789 = vmatprep.subr.mxu0 %v1490_v22 }
 0x35d   : > { %790 = vmatpush1.msra.mxu0 %v1497_v23 }
 0x35e   : > { %791 = vmatprep.subr.mxu0 %v1504_v24 }
 0x35f   : > { %792 = vmatpush1.msra.mxu0 %v1511_v25 }
 0x360   : > { %793 = vmatprep.subr.mxu0 %v1518_v26 }
 0x361   : > { %794 = vmatpush1.msra.mxu0 %v1525_v27 }
 0x362   : > { %795 = vmatprep.subr.mxu0 %v1532_v28 }
 0x363   : > { %796 = vmatpush1.msra.mxu0 %v1539_v29 }
 0x364   : > { %797 = vmatprep.subr.mxu0 %v1546_v30 }
 0x365   : > { %798 = vmatpush1.msra.mxu0 %v1553_v31 }
 0x366   : > { %799 = vmatprep.subr.mxu0 %v1560_v32 }
 0x367   : > { %800 = vmatpush1.msra.mxu0 %v1567_v33 }
 0x408   : > { %v659_v60 = vpop.f32.mrf.mxu0 }
 0x409   : > { %v664_v62 = vadd.f32 %v1064_v59, %v659_v60 }
 0x40a   : > { %v661_v63 = vpop.f32.mrf.mxu0 }
 0x40b   : > { %v665_v0 = vadd.f32 %v1065_v61, %v661_v63  ;;  %746 = vmatmul.mubr.f32.vlgmr.msra.gmra.mxu1 %v664_v62 }
 0x40c   : > { %858 = vmatpush1.msra.mxu1 %v1360_v2  ;;  %921 = vmatprep.mubr.f32.mxu1 %v1257_v5 }
 0x40d   : > { %666 = vmax.xlane.f32.xlu0 %v665_v0  ;;  %859 = vmatprep.subr.mxu1 %v1365_v3  ;;  %v1068_v3 = vld [vmem:[%s1344_s7 + $0x58] sm:$0xff] }
 0x40e   : > { %860 = vmatpush1.msra.mxu1 %v1371_v4 }
 0x40f   : > { %861 = vmatprep.subr.mxu1 %v1378_v6 }
 0x410   : > { %862 = vmatpush1.msra.mxu1 %v1385_v7  ;;  %v316_v7 = vpop.xlane.xlu0 %315 }
 0x411   : > { %863 = vmatprep.subr.mxu1 %v1392_v8  ;;  %v317_v8 = vsub.f32 %v1615_v40, %v316_v7 }
 0x412   : > { %864 = vmatpush1.msra.mxu1 %v1399_v9 }
 0x413   : > { %865 = vmatprep.subr.mxu1 %v1406_v10  ;;  %v491_v10 = vpop.xlane.xlu1 %490 }
 0x414   : > { %866 = vmatpush1.msra.mxu1 %v1413_v11  ;;  %v403_v9 = vpop.xlane.xlu0 %402  ;;  %v318_v11 = vmul.f32 1.442695, %v317_v8 }
 0x415   : > { %867 = vmatprep.subr.mxu1 %v1420_v12  ;;  %v492_v12 = vsub.f32 %v1691_v52, %v491_v10  ;;  %v404_v42 = vsub.f32 %v1653_v46, %v403_v9 }
 0x416   : > { %868 = vmatpush1.msra.mxu1 %v1427_v13  ;;  %1135 = vpow2.f32 %v318_v11 }
 0x417   : > { %869 = vmatprep.subr.mxu1 %v1434_v14  ;;  %v493_v14 = vmul.f32 1.442695, %v492_v12  ;;  %v579_v43 = vpop.xlane.xlu1 %578  ;;  %v405_v44 = vmul.f32 1.442695, %v404_v42 }
 0x418   : > { %870 = vmatpush1.msra.mxu1 %v1441_v15  ;;  %v580_v45 = vsub.f32 %v1729_v58, %v579_v43 }
 0x419   : > { %871 = vmatprep.subr.mxu1 %v1448_v16  ;;  %v1070_v16 = vld [vmem:[%s1344_s7 + $0x60] sm:$0xff]  ;;  %1137 = vpow2.f32 %v493_v14 }
 0x41a   : > { %872 = vmatpush1.msra.mxu1 %v1455_v17  ;;  %v581_v48 = vmul.f32 1.442695, %v580_v45 }
 0x41b   : > { %873 = vmatprep.subr.mxu1 %v1462_v18 }
 0x41c   : > { %874 = vmatpush1.msra.mxu1 %v1469_v19  ;;  %v1071_v19 = vld [vmem:[%s1344_s7 + $0x68] sm:$0xff] }
 0x41d   : > { %875 = vmatprep.subr.mxu1 %v1476_v20 }
 0x41e   : > { %876 = vmatpush1.msra.mxu1 %v1483_v21 }
 0x41f   : > { %877 = vmatprep.subr.mxu1 %v1490_v22 }
 0x420   : > { %878 = vmatpush1.msra.mxu1 %v1497_v23 }
 0x421   : > { %879 = vmatprep.subr.mxu1 %v1504_v24 }
 0x422   : > { %880 = vmatpush1.msra.mxu1 %v1511_v25 }
 0x423   : > { %881 = vmatprep.subr.mxu1 %v1518_v26  ;;  %v1136_v23 = vpop.eup %1135 }
 0x424   : > { %882 = vmatpush1.msra.mxu1 %v1525_v27 }
 0x425   : > { %883 = vmatprep.subr.mxu1 %v1532_v28 }
 0x426   : > { %884 = vmatpush1.msra.mxu1 %v1539_v29  ;;  %v1138_v24 = vpop.eup %1137 }
 0x427   : > { %885 = vmatprep.subr.mxu1 %v1546_v30 }
 0x428   : > { %886 = vmatpush1.msra.mxu1 %v1553_v31 }
 0x429   : > { %887 = vmatprep.subr.mxu1 %v1560_v32 }
 0x42a   : > { %888 = vmatpush1.msra.mxu1 %v1567_v33 }
 0x496   : > { %v667_v13 = vpop.xlane.xlu0 %666 }
 0x497   : > { %v668_v15 = vsub.f32 %v665_v0, %v667_v13 }
 0x499   : > { %v669_v17 = vmul.f32 1.442695, %v668_v15 }
 0x49b   : > { %1139 = vpow2.f32 %v669_v17 }
 0x4a8   : > { %v1140_v25 = vpop.eup %1139 }
 0x4cb   : > { %v747_v2 = vpop.f32.mrf.mxu1 }
 0x4cc   : > { %v752_v4 = vadd.f32 %v1067_v1, %v747_v2 }
 0x4cd   : > { %v749_v5 = vpop.f32.mrf.mxu1 }
 0x4ce   : > { %v753_v6 = vadd.f32 %v1068_v3, %v749_v5  ;;  %834 = vmatmul.mubr.f32.vlgmr.msra.gmra.mxu0 %v752_v4 }
 0x4d0   : > { %754 = vmax.xlane.f32.xlu1 %v753_v6 }
 0x559   : > { %v755_v47 = vpop.xlane.xlu1 %754 }
 0x55a   : > { %v756_v49 = vsub.f32 %v753_v6, %v755_v47 }
 0x55c   : > { %v757_v51 = vmul.f32 1.442695, %v756_v49 }
 0x58e   : > { %v835_v18 = vpop.f32.mrf.mxu0 }
 0x58f   : > { %v840_v20 = vadd.f32 %v1070_v16, %v835_v18 }
 0x590   : > { %v837_v21 = vpop.f32.mrf.mxu0 }
 0x591   : > { %v841_v22 = vadd.f32 %v1071_v19, %v837_v21  ;;  %922 = vmatmul.mubr.f32.vlgmr.msra.gmra.mxu1 %v840_v20 }
 0x593   : > { %842 = vmax.xlane.f32.xlu0 %v841_v22 }
 0x597   : > { %320 = vadd.xlane.f32.xlu0 %v1136_v23 }
 0x59b   : > { %495 = vadd.xlane.f32.xlu0 %v1138_v24 }
 0x59f   : > { %671 = vadd.xlane.f32.xlu0 %v1140_v25 }
 0x61c   : > { %v843_v26 = vpop.xlane.xlu0 %842 }
 0x61d   : > { %v844_v27 = vsub.f32 %v841_v22, %v843_v26 }
 0x61f   : > { %v845_v28 = vmul.f32 1.442695, %v844_v27 }
 0x620   : > { %v321_v29 = vpop.xlane.xlu0 %320 }
 0x621   : > { %1141 = vpow2.f32 %v845_v28 }
 0x622   : > { %1143 = vlog2.f32 %v321_v29 }
 0x624   : > { %v496_v30 = vpop.xlane.xlu0 %495 }
 0x625   : > { %1145 = vlog2.f32 %v496_v30 }
 0x628   : > { %v672_v31 = vpop.xlane.xlu0 %671 }
 0x629   : > { %1147 = vlog2.f32 %v672_v31 }
 0x62a   : > { %1149 = vpow2.f32 %v405_v44 }
 0x62b   : > { %1151 = vpow2.f32 %v581_v48 }
 0x62c   : > { %1153 = vpow2.f32 %v757_v51 }
 0x62e   : > { %v1142_v32 = vpop.eup %1141 }
 0x62f   : > { %v1144_v33 = vpop.eup %1143  ;;  %847 = vadd.xlane.f32.xlu0 %v1142_v32 }
 0x630   : > { %v323_v34 = vmul.f32 0.6931472, %v1144_v33 }
 0x632   : > { %v1146_v35 = vpop.eup %1145  ;;  %v324_v36 = vsub.f32 %v317_v8, %v323_v34 }
 0x633   : > { %v498_v37 = vmul.f32 0.6931472, %v1146_v35 }
 0x634   : > { %325 = vst [vmem:[%s1346_s8] sm:$0xff] %v324_v36 }
 0x635   : > { %v499_v38 = vsub.f32 %v492_v12, %v498_v37 }
 0x636   : > { %v1148_v39 = vpop.eup %1147 }
 0x637   : > { %1060 = vst [vmem:[%s1346_s8 + $0x10] sm:$0xff] %v499_v38  ;;  %v674_v40 = vmul.f32 0.6931472, %v1148_v39  ;;  %v1150_v46 = vpop.eup %1149 }
 0x638   : > { %v1152_v57 = vpop.eup %1151 }
 0x639   : > { %v675_v41 = vsub.f32 %v668_v15, %v674_v40  ;;  %v1154_v58 = vpop.eup %1153 }
 0x63b   : > { %1066 = vst [vmem:[%s1346_s8 + $0x20] sm:$0xff] %v675_v41 }
 0x651   : > { %v923_v52 = vpop.f32.mrf.mxu1 }
 0x652   : > { %v928_v54 = vadd.f32 %v1073_v50, %v923_v52 }
 0x653   : > { %v925_v55 = vpop.f32.mrf.mxu1 }
 0x654   : > { %942 = vst [vmem:[#allocation2] sm:$0xff] %v928_v54  ;;  %v929_v56 = vadd.f32 %v1074_v53, %v925_v55 }
 0x656   : > { %930 = vmax.xlane.f32.xlu1 %v929_v56 }
 0x65a   : > { %407 = vadd.xlane.f32.xlu1 %v1150_v46 }
 0x65e   : > { %583 = vadd.xlane.f32.xlu1 %v1152_v57 }
 0x662   : > { %759 = vadd.xlane.f32.xlu1 %v1154_v58 }
 0x6b8   : > { %v848_v59 = vpop.xlane.xlu0 %847 }
 0x6b9   : > { %1155 = vlog2.f32 %v848_v59 }
 0x6c6   : > { %v1156_v60 = vpop.eup %1155 }
 0x6c7   : > { %v850_v61 = vmul.f32 0.6931472, %v1156_v60 }
 0x6c9   : > { %v851_v62 = vsub.f32 %v844_v27, %v850_v61 }
 0x6cb   : > { %1072 = vst [vmem:[%s1346_s8 + $0x30] sm:$0xff] %v851_v62 }
 0x6df   : > { %v931_v63 = vpop.xlane.xlu1 %930 }
 0x6e0   : > { %v932_v0 = vsub.f32 %v929_v56, %v931_v63 }
 0x6e2   : > { %v933_v1 = vmul.f32 1.442695, %v932_v0 }
 0x6e3   : > { %v408_v2 = vpop.xlane.xlu1 %407 }
 0x6e4   : > { %1157 = vpow2.f32 %v933_v1 }
 0x6e5   : > { %1159 = vlog2.f32 %v408_v2 }
 0x6e7   : > { %v584_v3 = vpop.xlane.xlu1 %583 }
 0x6e8   : > { %1161 = vlog2.f32 %v584_v3 }
 0x6eb   : > { %v760_v4 = vpop.xlane.xlu1 %759 }
 0x6ec   : > { %1163 = vlog2.f32 %v760_v4 }
 0x6f1   : > { %v1158_v5 = vpop.eup %1157 }
 0x6f2   : > { %v1160_v6 = vpop.eup %1159  ;;  %935 = vadd.xlane.f32.xlu1 %v1158_v5 }
 0x6f3   : > { %v410_v7 = vmul.f32 0.6931472, %v1160_v6 }
 0x6f5   : > { %v1162_v8 = vpop.eup %1161  ;;  %v411_v9 = vsub.f32 %v404_v42, %v410_v7 }
 0x6f6   : > { %v586_v10 = vmul.f32 0.6931472, %v1162_v8 }
 0x6f7   : > { %1057 = vst [vmem:[%s1346_s8 + $0x8] sm:$0xff] %v411_v9 }
 0x6f8   : > { %v587_v11 = vsub.f32 %v580_v45, %v586_v10 }
 0x6f9   : > { %v1164_v12 = vpop.eup %1163 }
 0x6fa   : > { %1063 = vst [vmem:[%s1346_s8 + $0x18] sm:$0xff] %v587_v11  ;;  %v762_v13 = vmul.f32 0.6931472, %v1164_v12 }
 0x6fc   : > { %v763_v14 = vsub.f32 %v756_v49, %v762_v13 }
 0x6fe   : > { %1069 = vst [vmem:[%s1346_s8 + $0x28] sm:$0xff] %v763_v14 }
 0x77b   : > { %v936_v15 = vpop.xlane.xlu1 %935 }
 0x77c   : > { %1165 = vlog2.f32 %v936_v15 }
 0x789   : > { %v1166_v16 = vpop.eup %1165 }
 0x78a   : > { %v938_v17 = vmul.f32 0.6931472, %v1166_v16  ;;  %946 = sbr.rel (%p1076_p12) target bundleno = 1936 (0x790), region = 40 }
 0x78c   : > { %v939_v18 = vsub.f32 %v932_v0, %v938_v17 }
 0x78e   : > { %1075 = vst [vmem:[%s1346_s8 + $0x38] sm:$0xff] %v939_v18 }
 0x78f   : > { %947 = vst [vmem:[#allocation5] sm:$0xff] %v928_v54 }
 0x790 PF: > { %s1085_s7 = sshll.u32 %s1308_s19, 10  ;;  %s962_s6 = sshll.u32 %s1346_s8, 4  ;;  %s1824_s6 = int_to_ptr.vmem [resolvable:$true] %s962_s6 }
 0x791   : > { %s1821_s5 = scalar_lea.hbm %s1882_s3, %s1085_s7  ;;  %s1828_s9 = scalar_lea.sflag [#allocation4], %s188_s27 }
 0x792   : > { %s1167_s10 = scalar_lea.vmem %s1824_s6, 1024  ;;  %s1258_s11 = smov [#allocation3]  }
 0x793   : > { %p1168_p13 = scmp.ne.s32.totalorder %s1824_s6, %s1167_s10  ;;  %s1171_s12 = sshll.u32 %s1258_s11, 4  ;;  %s1172_s12 = int_to_ptr.vmem [resolvable:$false] %s1171_s12 }
 0x794   : > { %s1173_s13 = scalar_lea.vmem %s1172_s12, 2048  ;;  %p1174_p3 = scmp.lt.s32.totalorder %s1824_s6, %s1172_s12 }
 0x795   : > { %p1169_p0 = pnand %p1168_p13, %p1327_p5  ;;  %p1175_p4 = scmp.lt.s32.totalorder %s1173_s13, %s1167_s10 }
 0x797   : > { %p1170_p1 = pneg %p1169_p0  ;;  %p1176_p7 = por %p1175_p4, %p1174_p3 }
 0x799   : > { %p1177_p8 = pnand %p1176_p7, %p1170_p1 }
 0x79b   : > { %1180 = shalt.err (!%p1177_p8)
}
 0x79c   : > { %s1181_s27 = scalar_lea.hbm %s1821_s5, 1024  ;;  %s1185_s20 = scalar_lea.hbm %s1882_s3, 2048 }
 0x79d   : > { %p1182_p9 = scmp.ne.s32.totalorder %s1821_s5, %s1181_s27  ;;  %p1186_p12 = scmp.lt.s32.totalorder %s1821_s5, %s1882_s3 }
 0x79e   : > { %p1187_p13 = scmp.lt.s32.totalorder %s1185_s20, %s1181_s27 }
 0x79f   : > { %p1183_p10 = pnand %p1182_p9, %p1327_p5 }
 0x7a0   : > { %p1188_p0 = por %p1187_p13, %p1186_p12 }
 0x7a1   : > { %p1184_p11 = pneg %p1183_p10 }
 0x7a3   : > { %p1189_p1 = pnand %p1188_p0, %p1184_p11 }
 0x7a5   : > { %1192 = shalt.err (!%p1189_p1)
}
 0x7a6   : > { %s1259_s28 = smov 128   ;;  %s1260_s7 = smov 8  }
 0x7a7   : > { %1086 = dma.vmem_to_hbm [thread:$0]  (%p1327_p5), %s1824_s6, 1024, %s1821_s5, %s1828_s9, %s1259_s28, %s1259_s28, %s1260_s7  }
 0x7a8   : > { %s1261_s29 = smov [#allocation5]  }
 0x7a9   : > { %s976_s30 = sshll.u32 %s1261_s29, 4  ;;  %s977_s30 = int_to_ptr.vmem [resolvable:$true] %s976_s30 }
 0x7aa   : > { %s1193_s10 = scalar_lea.vmem %s977_s30, 128  ;;  %p1200_p8 = scmp.lt.s32.totalorder %s977_s30, %s977_s30 }
 0x7ab   : > { %p1194_p3 = scmp.ne.s32.totalorder %s977_s30, %s1193_s10  ;;  %p1201_p9 = scmp.lt.s32.totalorder %s1193_s10, %s1193_s10 }
 0x7ad   : > { %p1195_p4 = pnand %p1194_p3, %p105_p2  ;;  %p1202_p10 = por %p1201_p9, %p1200_p8 }
 0x7af   : > { %p1196_p7 = pneg %p1195_p4 }
 0x7b1   : > { %p1203_p11 = pnand %p1202_p10, %p1196_p7 }
 0x7b3   : > { %1206 = shalt.err (!%p1203_p11)
}
 0x7b4   : > { %1088 = dma.vmem_to_hbm [thread:$0]  (%p105_p2), %s977_s30, 128, %s1883_s4, [#allocation6]  }
 0x7b5   : > { %1234 = dma.done.wait (%p105_p2), [#allocation6], 128  }
 0x7b6   : > { %1236 = vsyncadd (%p105_p2), [#allocation6], 4294967168 }
 0x7b7 PF: > { %p1098_p5 = scmp.ge.s32.totalorder %s1255_s18, 2  ;;  %s992_s25 = sand.u32 1, %s1243_s15  }
 0x7b8   : > { %s993_s5 = scalar_lea.sflag [#allocation4], %s992_s25 }
 0x7b9   : > { %p1093_p12 = pnand %p1098_p5, %p1331_p6 }
 0x7bb   : > { %p1094_p13 = pneg %p1093_p12 }
 0x7bd   : > { %1238 = dma.done.wait (%p1094_p13), %s993_s5, 1024  }
 0x7be   : > { %1240 = vsyncadd (%p1094_p13), %s993_s5, 4294966272  ;;  %p16_p0 = scmp.ge.s32.totalorder %s1312_s21, 4   ;;  %s1886_s15 = smov %s1247_s16 }
 0x7bf   : > { %s1887_s16 = smov %s1251_s17  ;;  %s1888_s17 = smov %s1323_s24 }
 0x7c0   : > { %s1889_s18 = smov %s1312_s21  ;;  %18 = sbr.rel (!%p16_p0) target bundleno = 4 (0x4), region = 97 }
 0x7c5   :  { %998 = vsyncpa [#allocation4], 1 }
 0x7c6   :  { %1000 = vsyncpa [#allocation4 + $0x1], 1 }
 0x7c7   :  { %1001 = vsyncpa [#allocation6], 1 }

</bundles_post_ra>
